<compile_context>
chip_gen: v5e
topology: v5e:2x2
jax: 0.10.0
libtpu: 0.0.40
codegen_flags: <defaults>
</compile_context>

<pallas_src>
import functools

import jax
import jax.numpy as jnp
import numpy as np
from jax.experimental import pallas as pl
from jax.experimental.pallas import tpu as pltpu

N_FEATURES = 28 * 28   # 784
N_HIDDEN_1 = 128
N_HIDDEN_2 = 64


def _round_up(x, m):
    return ((x + m - 1) // m) * m


def _sigmoid_f32(x):
    # Single EUP transcendental (tanh); avoids exp + VALU divide.
    return 0.5 * (jnp.tanh(0.5 * x) + 1.0)


def _decoder_kernel(x_ref, w3_ref, b3_ref, w4_ref, b4_ref, out_ref):
    # fc3: cast the f32 activation tile to bf16 for the MXU; f32 accumulation.
    x_bf = x_ref[...].astype(jnp.bfloat16)
    h = jnp.dot(x_bf, w3_ref[...], preferred_element_type=jnp.float32)
    h = _sigmoid_f32(h + b3_ref[...])                       # f32 element-wise
    # fc4: bf16 MXU operand, f32 accumulation; store at true 784-lane width.
    o = jnp.dot(h.astype(jnp.bfloat16), w4_ref[...],
                preferred_element_type=jnp.float32)
    out_ref[...] = _sigmoid_f32(o + b4_ref[...]).astype(out_ref.dtype)


def prepare_params(w3, b3, w4, b4):
    """One-time param prep (outside the per-call path): bf16 weights, f32 biases."""
    return (w3.astype(jnp.bfloat16), b3.astype(jnp.float32),
            w4.astype(jnp.bfloat16), b4.astype(jnp.float32))


@functools.partial(jax.jit, static_argnames=("block_b",))
def decoder_forward(x, w3_bf, b3_f, w4_bf, b4_f, *, block_b=512):
    """x: (B, 64) f32 -> (B, 784) f32."""
    B = x.shape[0]

    # Row tile: multiple of 8 (f32 sublane), <= block_b, and >= 2 grid steps
    # when B allows (keeps both v7x TensorCores busy).  The ragged last block
    # is handled by Pallas via masked output stores, so no row padding needed.
    n_steps = max(pl.cdiv(B, block_b), 2 if B >= 16 else 1)
    TB = _round_up(pl.cdiv(B, n_steps), 8)
    grid = (pl.cdiv(B, TB),)

    # Double-buffered x/out tiles + (double-buffered) resident params, in bytes.
    est_vmem = (2 * TB * (N_HIDDEN_2 + N_FEATURES) * 4
                + 2 * (N_HIDDEN_2 * N_HIDDEN_1 + N_HIDDEN_1 * N_FEATURES) * 2
                + 2 * (N_HIDDEN_1 + N_FEATURES) * 4)
    # Only override the scoped-VMEM limit if we'd exceed v5e's 16 MiB default.
    vmem_limit = est_vmem + (2 << 20) if est_vmem > (14 << 20) else None

    return pl.pallas_call(
        _decoder_kernel,
        out_shape=jax.ShapeDtypeStruct((B, N_FEATURES), jnp.float32),
        grid=grid,
        in_specs=[
            pl.BlockSpec((TB, N_HIDDEN_2), lambda i: (i, 0)),              # x tile (f32)
            pl.BlockSpec((N_HIDDEN_2, N_HIDDEN_1), lambda i: (0, 0)),      # w3 (resident)
            pl.BlockSpec((1, N_HIDDEN_1), lambda i: (0, 0)),               # b3 (resident)
            pl.BlockSpec((N_HIDDEN_1, N_FEATURES), lambda i: (0, 0)),      # w4 (resident)
            pl.BlockSpec((1, N_FEATURES), lambda i: (0, 0)),               # b4 (resident)
        ],
        out_specs=pl.BlockSpec((TB, N_FEATURES), lambda i: (i, 0)),
        compiler_params=pltpu.CompilerParams(
            dimension_semantics=("parallel",),
            vmem_limit_bytes=vmem_limit,
        ),
    )(x, w3_bf, b3_f, w4_bf, b4_f)


def init_params(key):
    """PyTorch nn.Linear-style init: U(-1/sqrt(fan_in), 1/sqrt(fan_in))."""
    k1, k2, k3, k4 = jax.random.split(key, 4)
    bound3 = 1.0 / np.sqrt(N_HIDDEN_2)
    bound4 = 1.0 / np.sqrt(N_HIDDEN_1)
    # stored as (in, out) so the kernel computes x @ W
    w3 = jax.random.uniform(k1, (N_HIDDEN_2, N_HIDDEN_1), jnp.float32, -bound3, bound3)
    b3 = jax.random.uniform(k2, (1, N_HIDDEN_1), jnp.float32, -bound3, bound3)
    w4 = jax.random.uniform(k3, (N_HIDDEN_1, N_FEATURES), jnp.float32, -bound4, bound4)
    b4 = jax.random.uniform(k4, (1, N_FEATURES), jnp.float32, -bound4, bound4)
    return w3, b3, w4, b4


def decoder_ref(x, w3, b3, w4, b4):
    h = jax.nn.sigmoid(x @ w3 + b3)
    return jax.nn.sigmoid(h @ w4 + b4)


if __name__ == "__main__":
    key = jax.random.PRNGKey(0)
    kx, kx2, kp = jax.random.split(key, 3)
    w3, b3, w4, b4 = init_params(kp)
    w3_bf, b3_f, w4_bf, b4_f = prepare_params(w3, b3, w4, b4)

    # Small test (single grid step).
    B = 8
    x = jax.random.normal(kx, (B, N_HIDDEN_2), jnp.float32)
    out = jax.block_until_ready(decoder_forward(x, w3_bf, b3_f, w4_bf, b4_f))
    assert out.shape == (B, N_FEATURES)
    ref = decoder_ref(x, w3, b3, w4, b4)
    # bf16 MXU operands -> loosened tolerance vs. pure-f32 reference.
    np.testing.assert_allclose(np.asarray(out), np.asarray(ref), atol=2e-2, rtol=2e-2)

    # Larger, non-multiple-of-tile batch: exercises the ragged batch grid
    # (2 grid steps, masked partial last block, no row padding / slicing).
    B2 = 300
    x2 = jax.random.normal(kx2, (B2, N_HIDDEN_2), jnp.float32)
    out2 = jax.block_until_ready(decoder_forward(x2, w3_bf, b3_f, w4_bf, b4_f))
    assert out2.shape == (B2, N_FEATURES)
    ref2 = decoder_ref(x2, w3, b3, w4, b4)
    np.testing.assert_allclose(np.asarray(out2), np.asarray(ref2), atol=2e-2, rtol=2e-2)

    print("KERNEL_OK")
</pallas_src>

<mosaic_0001>
module attributes {stable_mosaic.version = 11 : i64} {
  func.func @_decoder_kernel(%arg0: i32, %arg1: memref<8x64xf32, #tpu.memory_space<vmem>>, %arg2: memref<64x128xbf16, #tpu.memory_space<vmem>>, %arg3: memref<1x128xf32, #tpu.memory_space<vmem>>, %arg4: memref<128x784xbf16, #tpu.memory_space<vmem>>, %arg5: memref<1x784xf32, #tpu.memory_space<vmem>>, %arg6: memref<8x784xf32, #tpu.memory_space<vmem>>) attributes {dimension_semantics = [#tpu.dimension_semantics<parallel>], iteration_bounds = array<i64: 1>, scalar_prefetch = 0 : i64, scratch_operands = 0 : i64, tpu.core_type = #tpu.core_type<tc>, window_params = [{transform_indices = @transform_0, window_bounds = array<i64: 8, 64>}, {pipeline_mode = #tpu.pipeline_mode<synchronous>, transform_indices = @transform_1, window_bounds = array<i64: 64, 128>}, {pipeline_mode = #tpu.pipeline_mode<synchronous>, transform_indices = @transform_2, window_bounds = array<i64: 1, 128>}, {pipeline_mode = #tpu.pipeline_mode<synchronous>, transform_indices = @transform_3, window_bounds = array<i64: 128, 784>}, {pipeline_mode = #tpu.pipeline_mode<synchronous>, transform_indices = @transform_4, window_bounds = array<i64: 1, 784>}, {transform_indices = @transform_5, window_bounds = array<i64: 8, 784>}]} {
    %c0 = arith.constant 0 : index
    %c0_0 = arith.constant 0 : index
    %0 = vector.load %arg1[%c0, %c0_0] : memref<8x64xf32, #tpu.memory_space<vmem>>, vector<8x64xf32>
    %1 = arith.truncf %0 : vector<8x64xf32> to vector<8x64xbf16>
    %c0_1 = arith.constant 0 : index
    %c0_2 = arith.constant 0 : index
    %2 = vector.load %arg2[%c0_1, %c0_2] : memref<64x128xbf16, #tpu.memory_space<vmem>>, vector<64x128xbf16>
    %cst = arith.constant dense<0.000000e+00> : vector<8x128xf32>
    %3 = tpu.matmul %1, %2, %cst {dimension_numbers = #tpu.dot_dimension_numbers<[1], [0], [0], [1], [0, 0, 1, 1], [], []>} : vector<8x64xbf16>, vector<64x128xbf16>, vector<8x128xf32> -> vector<8x128xf32>
    %c0_3 = arith.constant 0 : index
    %c0_4 = arith.constant 0 : index
    %4 = vector.load %arg3[%c0_3, %c0_4] : memref<1x128xf32, #tpu.memory_space<vmem>>, vector<1x128xf32>
    %5 = vector.broadcast %4 : vector<1x128xf32> to vector<8x128xf32>
    %6 = arith.addf %3, %5 : vector<8x128xf32>
    %cst_5 = arith.constant 5.000000e-01 : f32
    %7 = vector.broadcast %cst_5 : f32 to vector<8x128xf32>
    %8 = arith.mulf %7, %6 : vector<8x128xf32>
    %9 = math.tanh %8 : vector<8x128xf32>
    %cst_6 = arith.constant 1.000000e+00 : f32
    %10 = vector.broadcast %cst_6 : f32 to vector<8x128xf32>
    %11 = arith.addf %9, %10 : vector<8x128xf32>
    %cst_7 = arith.constant 5.000000e-01 : f32
    %12 = vector.broadcast %cst_7 : f32 to vector<8x128xf32>
    %13 = arith.mulf %12, %11 : vector<8x128xf32>
    %14 = arith.truncf %13 : vector<8x128xf32> to vector<8x128xbf16>
    %c0_8 = arith.constant 0 : index
    %c0_9 = arith.constant 0 : index
    %15 = vector.load %arg4[%c0_8, %c0_9] : memref<128x784xbf16, #tpu.memory_space<vmem>>, vector<128x784xbf16>
    %cst_10 = arith.constant dense<0.000000e+00> : vector<8x784xf32>
    %16 = tpu.matmul %14, %15, %cst_10 {dimension_numbers = #tpu.dot_dimension_numbers<[1], [0], [0], [1], [0, 0, 1, 1], [], []>} : vector<8x128xbf16>, vector<128x784xbf16>, vector<8x784xf32> -> vector<8x784xf32>
    %c0_11 = arith.constant 0 : index
    %c0_12 = arith.constant 0 : index
    %17 = vector.load %arg5[%c0_11, %c0_12] : memref<1x784xf32, #tpu.memory_space<vmem>>, vector<1x784xf32>
    %18 = vector.broadcast %17 : vector<1x784xf32> to vector<8x784xf32>
    %19 = arith.addf %16, %18 : vector<8x784xf32>
    %cst_13 = arith.constant 5.000000e-01 : f32
    %20 = vector.broadcast %cst_13 : f32 to vector<8x784xf32>
    %21 = arith.mulf %20, %19 : vector<8x784xf32>
    %22 = math.tanh %21 : vector<8x784xf32>
    %cst_14 = arith.constant 1.000000e+00 : f32
    %23 = vector.broadcast %cst_14 : f32 to vector<8x784xf32>
    %24 = arith.addf %22, %23 : vector<8x784xf32>
    %cst_15 = arith.constant 5.000000e-01 : f32
    %25 = vector.broadcast %cst_15 : f32 to vector<8x784xf32>
    %26 = arith.mulf %25, %24 : vector<8x784xf32>
    %c0_16 = arith.constant 0 : index
    %c0_17 = arith.constant 0 : index
    %27 = vector.load %arg6[%c0_16, %c0_17] : memref<8x784xf32, #tpu.memory_space<vmem>>, vector<8x784xf32>
    tpu.vector_store %arg6[%c0_16, %c0_17], %26 {strides = array<i32>} : memref<8x784xf32, #tpu.memory_space<vmem>>, vector<8x784xf32>,
    return
  }
  func.func @transform_0(%arg0: i32) -> (i32, i32) {
    %c0_i32 = arith.constant 0 : i32
    %c0_i32_0 = arith.constant 0 : i32
    return %arg0, %c0_i32 : i32, i32
  }
  func.func @transform_1(%arg0: i32) -> (i32, i32) {
    %c0_i32 = arith.constant 0 : i32
    %c0_i32_0 = arith.constant 0 : i32
    %c0_i32_1 = arith.constant 0 : i32
    return %c0_i32, %c0_i32_0 : i32, i32
  }
  func.func @transform_2(%arg0: i32) -> (i32, i32) {
    %c0_i32 = arith.constant 0 : i32
    %c0_i32_0 = arith.constant 0 : i32
    %c0_i32_1 = arith.constant 0 : i32
    return %c0_i32, %c0_i32_0 : i32, i32
  }
  func.func @transform_3(%arg0: i32) -> (i32, i32) {
    %c0_i32 = arith.constant 0 : i32
    %c0_i32_0 = arith.constant 0 : i32
    %c0_i32_1 = arith.constant 0 : i32
    return %c0_i32, %c0_i32_0 : i32, i32
  }
  func.func @transform_4(%arg0: i32) -> (i32, i32) {
    %c0_i32 = arith.constant 0 : i32
    %c0_i32_0 = arith.constant 0 : i32
    %c0_i32_1 = arith.constant 0 : i32
    return %c0_i32, %c0_i32_0 : i32, i32
  }
  func.func @transform_5(%arg0: i32) -> (i32, i32) {
    %c0_i32 = arith.constant 0 : i32
    %c0_i32_0 = arith.constant 0 : i32
    return %arg0, %c0_i32 : i32, i32
  }
}

</mosaic_0001>

<bundles_post_ra>
// kernel: decoder_forward.1
= control target key start
LH: loop header
LB: loop body
LE: loop exit
PB: predicated region body
PF: predicated region fallthrough
CT: control target
= control target key end

     0   :  { %vm60_vm0 = vcmask 523264   ;;  %s1330_s0 = inlined_call_operand.vmem [shape: f32[8,64], index: 0, kind: input, shape index: {}]   ;;  %s1331_s1 = inlined_call_operand.vmem [shape: bf16[64,128], index: 1, kind: input, shape index: {}]   ;;  %s1332_s2 = inlined_call_operand.vmem [shape: f32[1,128], index: 2, kind: input, shape index: {}]   ;;  %s1333_s3 = inlined_call_operand.vmem [shape: bf16[128,784], index: 3, kind: input, shape index: {}]   ;;  %s1334_s4 = inlined_call_operand.vmem [shape: f32[1,784], index: 4, kind: input, shape index: {}]   ;;  %s1335_s5 = inlined_call_operand.hbm [shape: f32[8,784], index: 5, kind: output, shape index: {}]  }
   0x1   :  { %v837_v0 = vld [vmem:[%s1331_s1 + $0x18] sm:$0xff]  ;;  %v836_v1 = vld [vmem:[%s1331_s1 + $0x10] sm:$0xff]  ;;  %v808_v2 = vld [vmem:[%s1333_s3 + $0x188] sm:$0xf] }
   0x2   :  { %68 = vmatpush.bf16.msra.mxu0 %v837_v0  ;;  %v890_v3 = vld [vmem:[%s1333_s3 + $0x1a0] sm:$0xf0]  ;;  %v887_v4 = vld [vmem:[%s1333_s3 + $0x18c] sm:$0xf]  ;;  %v810_v5 = vld [vmem:[%s1333_s3 + $0x1a4] sm:$0xf0] }
   0x3   :  { %v809_v6 = vor.u32 %v890_v3, %v808_v2  ;;  %v813_v7 = vor.u32 %v887_v4, %v810_v5  ;;  %v816_v8 = vld [vmem:[%s1333_s3 + $0x190] sm:$0xf]  ;;  %v891_v9 = vld [vmem:[%s1333_s3 + $0x1a8] sm:$0xf0]  ;;  %v880_v14 = vld [vmem:[%s1333_s3 + $0x154] sm:$0xf] }
   0x4   :  { %v780_v10 = vld [vmem:[%s1333_s3 + $0x150] sm:$0xf]  ;;  %v835_v11 = vld [vmem:[%s1331_s1 + $0x8] sm:$0xff]  ;;  %v817_v12 = vor.u32 %v891_v9, %v816_v8  ;;  %v788_v18 = vld [vmem:[%s1333_s3 + $0x158] sm:$0xf] }
   0x5   :  { %v883_v13 = vld [vmem:[%s1333_s3 + $0x168] sm:$0xf0]  ;;  %v782_v15 = vld [vmem:[%s1333_s3 + $0x16c] sm:$0xf0]  ;;  %450 = vmatpush.bf16.msra.mxu1 %v809_v6  ;;  %463 = vmatpush.bf16.msra.mxu2 %v813_v7  ;;  %v884_v19 = vld [vmem:[%s1333_s3 + $0x170] sm:$0xf0] }
   0x6   :  { %v781_v16 = vor.u32 %v883_v13, %v780_v10  ;;  %v785_v17 = vor.u32 %v880_v14, %v782_v15  ;;  %v752_v20 = vld [vmem:[%s1333_s3 + $0x118] sm:$0xf]  ;;  %69 = vmatpush.bf16.msra.mxu0 %v836_v1  ;;  %476 = vmatpush.bf16.msra.mxu3 %v817_v12  ;;  %v789_v21 = vor.u32 %v884_v19, %v788_v18  ;;  %v876_v22 = vld [vmem:[%s1333_s3 + $0x130] sm:$0xf0]  ;;  %v873_v23 = vld [vmem:[%s1333_s3 + $0x11c] sm:$0xf] }
   0x7   :  { %v754_v24 = vld [vmem:[%s1333_s3 + $0x134] sm:$0xf0]  ;;  %v760_v25 = vld [vmem:[%s1333_s3 + $0x120] sm:$0xf]  ;;  %v877_v26 = vld [vmem:[%s1333_s3 + $0x138] sm:$0xf0]  ;;  %v753_v29 = vor.u32 %v876_v22, %v752_v20 }
   0x8   :  { %v834_v27 = vld [vmem:[%s1331_s1] sm:$0xff]  ;;  %v757_v30 = vor.u32 %v873_v23, %v754_v24  ;;  %v888_v32 = vld [vmem:[%s1333_s3 + $0x194] sm:$0xf]  ;;  %v761_v33 = vor.u32 %v877_v26, %v760_v25  ;;  %v869_v34 = vld [vmem:[%s1333_s3 + $0xf8] sm:$0xf0] }
   0x9   :  { %v22_v28 = vld [vmem:[%s1330_s0] sm:$0xff]  ;;  %451 = vmatpush.bf16.msra.mxu1 %v781_v16  ;;  %464 = vmatpush.bf16.msra.mxu2 %v785_v17  ;;  %v818_v36 = vld [vmem:[%s1333_s3 + $0x1ac] sm:$0xf0]  ;;  %v732_v38 = vld [vmem:[%s1333_s3 + $0xe8] sm:$0xf] }
   0xa   :  { %v724_v31 = vld [vmem:[%s1333_s3 + $0xe0] sm:$0xf]  ;;  %70 = vmatpush.bf16.msra.mxu0 %v835_v11  ;;  %477 = vmatpush.bf16.msra.mxu3 %v789_v21  ;;  %v866_v35 = vld [vmem:[%s1333_s3 + $0xe4] sm:$0xf]  ;;  %v821_v40 = vor.u32 %v888_v32, %v818_v36  ;;  %v881_v41 = vld [vmem:[%s1333_s3 + $0x15c] sm:$0xf]  ;;  %v23_v43 = vpack.c.bf16 %v22_v28, %v22_v28 }
   0xb   :  { %v726_v37 = vld [vmem:[%s1333_s3 + $0xfc] sm:$0xf0]  ;;  %v870_v39 = vld [vmem:[%s1333_s3 + $0x100] sm:$0xf0]  ;;  %v790_v42 = vld [vmem:[%s1333_s3 + $0x174] sm:$0xf0]  ;;  %v725_v44 = vor.u32 %v869_v34, %v724_v31 }
   0xc   :  { %v729_v45 = vor.u32 %v866_v35, %v726_v37  ;;  %v733_v46 = vor.u32 %v870_v39, %v732_v38  ;;  %v696_v47 = vld [vmem:[%s1333_s3 + $0xa8] sm:$0xf]  ;;  %v862_v48 = vld [vmem:[%s1333_s3 + $0xc0] sm:$0xf0]  ;;  %v859_v49 = vld [vmem:[%s1333_s3 + $0xac] sm:$0xf]  ;;  %v793_v53 = vor.u32 %v881_v41, %v790_v42 }
   0xd   :  { %452 = vmatpush.bf16.msra.mxu1 %v753_v29  ;;  %465 = vmatpush.bf16.msra.mxu2 %v757_v30  ;;  %v698_v50 = vld [vmem:[%s1333_s3 + $0xc4] sm:$0xf0]  ;;  %v704_v51 = vld [vmem:[%s1333_s3 + $0xb0] sm:$0xf]  ;;  %v863_v52 = vld [vmem:[%s1333_s3 + $0xc8] sm:$0xf0]  ;;  %v697_v56 = vor.u32 %v862_v48, %v696_v47 }
   0xe   :  { %71 = vmatpush.bf16.msra.mxu0 %v834_v27  ;;  %478 = vmatpush.bf16.msra.mxu3 %v761_v33  ;;  %v874_v54 = vld [vmem:[%s1333_s3 + $0x124] sm:$0xf]  ;;  %v762_v55 = vld [vmem:[%s1333_s3 + $0x13c] sm:$0xf0]  ;;  %v668_v57 = vld [vmem:[%s1333_s3 + $0x70] sm:$0xf]  ;;  %v701_v59 = vor.u32 %v859_v49, %v698_v50  ;;  %v705_v60 = vor.u32 %v863_v52, %v704_v51 }
   0xf   :  { %v855_v58 = vld [vmem:[%s1333_s3 + $0x88] sm:$0xf0]  ;;  %v852_v61 = vld [vmem:[%s1333_s3 + $0x74] sm:$0xf]  ;;  %v670_v62 = vld [vmem:[%s1333_s3 + $0x8c] sm:$0xf0]  ;;  %v765_v1 = vor.u32 %v874_v54, %v762_v55 }
  0x10   :  { %v676_v63 = vld [vmem:[%s1333_s3 + $0x78] sm:$0xf]  ;;  %v856_v0 = vld [vmem:[%s1333_s3 + $0x90] sm:$0xf0] }
  0x11   :  { %609 = vmatmul.msk.bf16.vlgmr.msra.gmra.mxu0 %vm60_vm0, %v23_v43  ;;  %453 = vmatpush.bf16.msra.mxu1 %v725_v44 }
  0x12   :  { %489 = vmatpush.bf16.msrb.mxu0 %v821_v40  ;;  %466 = vmatpush.bf16.msra.mxu2 %v729_v45 }
  0x13   :  { %479 = vmatpush.bf16.msra.mxu3 %v733_v46 }
  0x16   :  { %490 = vmatpush.bf16.msrb.mxu0 %v793_v53 }
  0x17   :  { %10 = vsyncpa [#allocation3], 0  ;;  %v867_v2 = vld [vmem:[%s1333_s3 + $0xec] sm:$0xf]  ;;  %v734_v3 = vld [vmem:[%s1333_s3 + $0x104] sm:$0xf0]  ;;  %454 = vmatpush.bf16.msra.mxu1 %v697_v56  ;;  %v669_v4 = vor.u32 %v855_v58, %v668_v57  ;;  %467 = vmatpush.bf16.msra.mxu2 %v701_v59  ;;  %v673_v5 = vor.u32 %v852_v61, %v670_v62  ;;  %v677_v6 = vor.u32 %v856_v0, %v676_v63 }
  0x18   :  { %480 = vmatpush.bf16.msra.mxu3 %v705_v60  ;;  %v640_v7 = vld [vmem:[%s1333_s3 + $0x38] sm:$0xf]  ;;  %v848_v8 = vld [vmem:[%s1333_s3 + $0x50] sm:$0xf0]  ;;  %v845_v9 = vld [vmem:[%s1333_s3 + $0x3c] sm:$0xf]  ;;  %v737_v13 = vor.u32 %v867_v2, %v734_v3 }
  0x19   :  { %v642_v10 = vld [vmem:[%s1333_s3 + $0x54] sm:$0xf0]  ;;  %v648_v11 = vld [vmem:[%s1333_s3 + $0x40] sm:$0xf]  ;;  %v849_v12 = vld [vmem:[%s1333_s3 + $0x58] sm:$0xf0]  ;;  %v641_v14 = vor.u32 %v848_v8, %v640_v7 }
  0x1a   :  { %491 = vmatpush.bf16.msrb.mxu0 %v765_v1  ;;  %v645_v15 = vor.u32 %v845_v9, %v642_v10  ;;  %v649_v16 = vor.u32 %v849_v12, %v648_v11  ;;  %v612_v17 = vld [vmem:[%s1333_s3] sm:$0xf]  ;;  %v841_v18 = vld [vmem:[%s1333_s3 + $0x18] sm:$0xf0]  ;;  %v838_v19 = vld [vmem:[%s1333_s3 + $0x4] sm:$0xf] }
  0x1b   :  { %455 = vmatpush.bf16.msra.mxu1 %v669_v4  ;;  %468 = vmatpush.bf16.msra.mxu2 %v673_v5  ;;  %v613_v20 = vor.u32 %v841_v18, %v612_v17  ;;  %v614_v21 = vld [vmem:[%s1333_s3 + $0x1c] sm:$0xf0]  ;;  %v620_v22 = vld [vmem:[%s1333_s3 + $0x8] sm:$0xf]  ;;  %v842_v23 = vld [vmem:[%s1333_s3 + $0x20] sm:$0xf0] }
  0x1c   :  { %481 = vmatpush.bf16.msra.mxu3 %v677_v6  ;;  %v617_v24 = vor.u32 %v838_v19, %v614_v21  ;;  %v621_v25 = vor.u32 %v842_v23, %v620_v22  ;;  %v860_v26 = vld [vmem:[%s1333_s3 + $0xb4] sm:$0xf]  ;;  %v706_v27 = vld [vmem:[%s1333_s3 + $0xcc] sm:$0xf0]  ;;  %v824_v28 = vld [vmem:[%s1333_s3 + $0x198] sm:$0xf] }
  0x1d   :  { %v709_v29 = vor.u32 %v860_v26, %v706_v27  ;;  %v892_v30 = vld [vmem:[%s1333_s3 + $0x1b0] sm:$0xf0]  ;;  %v889_v31 = vld [vmem:[%s1333_s3 + $0x19c] sm:$0xf]  ;;  %v826_v32 = vld [vmem:[%s1333_s3 + $0x1b4] sm:$0xf0] }
  0x1e   :  { %492 = vmatpush.bf16.msrb.mxu0 %v737_v13  ;;  %v825_v33 = vor.u32 %v892_v30, %v824_v28  ;;  %v829_v34 = vor.u32 %v889_v31, %v826_v32  ;;  %v832_v35 = vld [vmem:[%s1333_s3 + $0x1a0] sm:$0xf]  ;;  %v893_v36 = vld [vmem:[%s1333_s3 + $0x1b8] sm:$0xf0]  ;;  %v678_v39 = vld [vmem:[%s1333_s3 + $0x94] sm:$0xf0] }
  0x1f   :  { %456 = vmatpush.bf16.msra.mxu1 %v641_v14  ;;  %469 = vmatpush.bf16.msra.mxu2 %v645_v15  ;;  %v833_v37 = vor.u32 %v893_v36, %v832_v35  ;;  %v853_v38 = vld [vmem:[%s1333_s3 + $0x7c] sm:$0xf]  ;;  %v796_v40 = vld [vmem:[%s1333_s3 + $0x160] sm:$0xf]  ;;  %v882_v43 = vld [vmem:[%s1333_s3 + $0x164] sm:$0xf] }
  0x20   :  { %482 = vmatpush.bf16.msra.mxu3 %v649_v16  ;;  %v681_v41 = vor.u32 %v853_v38, %v678_v39  ;;  %v885_v42 = vld [vmem:[%s1333_s3 + $0x178] sm:$0xf0]  ;;  %v798_v44 = vld [vmem:[%s1333_s3 + $0x17c] sm:$0xf0]  ;;  %v804_v47 = vld [vmem:[%s1333_s3 + $0x168] sm:$0xf] }
  0x21   :  { %v797_v45 = vor.u32 %v885_v42, %v796_v40  ;;  %v801_v46 = vor.u32 %v882_v43, %v798_v44  ;;  %v886_v48 = vld [vmem:[%s1333_s3 + $0x180] sm:$0xf0]  ;;  %v650_v51 = vld [vmem:[%s1333_s3 + $0x5c] sm:$0xf0]  ;;  %v768_v52 = vld [vmem:[%s1333_s3 + $0x128] sm:$0xf] }
  0x22   :  { %493 = vmatpush.bf16.msrb.mxu0 %v709_v29  ;;  %v805_v49 = vor.u32 %v886_v48, %v804_v47  ;;  %v846_v50 = vld [vmem:[%s1333_s3 + $0x44] sm:$0xf]  ;;  %v875_v55 = vld [vmem:[%s1333_s3 + $0x12c] sm:$0xf]  ;;  %v770_v56 = vld [vmem:[%s1333_s3 + $0x144] sm:$0xf0] }
  0x23   :  { %457 = vmatpush.bf16.msra.mxu1 %v613_v20  ;;  %470 = vmatpush.bf16.msra.mxu2 %v617_v24  ;;  %v653_v53 = vor.u32 %v846_v50, %v650_v51  ;;  %v878_v54 = vld [vmem:[%s1333_s3 + $0x140] sm:$0xf0]  ;;  %v773_v58 = vor.u32 %v875_v55, %v770_v56  ;;  %v776_v59 = vld [vmem:[%s1333_s3 + $0x130] sm:$0xf]  ;;  %v879_v60 = vld [vmem:[%s1333_s3 + $0x148] sm:$0xf0] }
  0x24   :  { %483 = vmatpush.bf16.msra.mxu3 %v621_v25  ;;  %v769_v57 = vor.u32 %v878_v54, %v768_v52  ;;  %v777_v61 = vor.u32 %v879_v60, %v776_v59  ;;  %v839_v62 = vld [vmem:[%s1333_s3 + $0xc] sm:$0xf]  ;;  %v622_v63 = vld [vmem:[%s1333_s3 + $0x24] sm:$0xf0]  ;;  %v740_v0 = vld [vmem:[%s1333_s3 + $0xf0] sm:$0xf] }
  0x25   :  { %v625_v1 = vor.u32 %v839_v62, %v622_v63  ;;  %v871_v2 = vld [vmem:[%s1333_s3 + $0x108] sm:$0xf0]  ;;  %v868_v3 = vld [vmem:[%s1333_s3 + $0xf4] sm:$0xf]  ;;  %v742_v4 = vld [vmem:[%s1333_s3 + $0x10c] sm:$0xf0] }
  0x26   :  { %494 = vmatpush.bf16.msrb.mxu0 %v681_v41  ;;  %v741_v5 = vor.u32 %v871_v2, %v740_v0  ;;  %v745_v6 = vor.u32 %v868_v3, %v742_v4  ;;  %v748_v7 = vld [vmem:[%s1333_s3 + $0xf8] sm:$0xf]  ;;  %v872_v8 = vld [vmem:[%s1333_s3 + $0x110] sm:$0xf0]  ;;  %v861_v12 = vld [vmem:[%s1333_s3 + $0xbc] sm:$0xf] }
  0x27   :  { %502 = vmatpush.bf16.msrb.mxu1 %v825_v33  ;;  %515 = vmatpush.bf16.msrb.mxu2 %v829_v34  ;;  %v749_v9 = vor.u32 %v872_v8, %v748_v7  ;;  %v712_v10 = vld [vmem:[%s1333_s3 + $0xb8] sm:$0xf]  ;;  %v864_v11 = vld [vmem:[%s1333_s3 + $0xd0] sm:$0xf0]  ;;  %v720_v15 = vld [vmem:[%s1333_s3 + $0xc0] sm:$0xf] }
  0x28   :  { %528 = vmatpush.bf16.msrb.mxu3 %v833_v37  ;;  %v713_v13 = vor.u32 %v864_v11, %v712_v10  ;;  %v714_v14 = vld [vmem:[%s1333_s3 + $0xd4] sm:$0xf0]  ;;  %v865_v16 = vld [vmem:[%s1333_s3 + $0xd8] sm:$0xf0]  ;;  %v684_v19 = vld [vmem:[%s1333_s3 + $0x80] sm:$0xf] }
  0x29   :  { %v717_v17 = vor.u32 %v861_v12, %v714_v14  ;;  %v721_v18 = vor.u32 %v865_v16, %v720_v15  ;;  %v857_v20 = vld [vmem:[%s1333_s3 + $0x98] sm:$0xf0]  ;;  %v854_v21 = vld [vmem:[%s1333_s3 + $0x84] sm:$0xf]  ;;  %v686_v22 = vld [vmem:[%s1333_s3 + $0x9c] sm:$0xf0] }
  0x2a   :  { %495 = vmatpush.bf16.msrb.mxu0 %v653_v53  ;;  %v692_v23 = vld [vmem:[%s1333_s3 + $0x88] sm:$0xf]  ;;  %v858_v24 = vld [vmem:[%s1333_s3 + $0xa0] sm:$0xf0]  ;;  %v685_v25 = vor.u32 %v857_v20, %v684_v19  ;;  %v689_v26 = vor.u32 %v854_v21, %v686_v22  ;;  %v847_v30 = vld [vmem:[%s1333_s3 + $0x4c] sm:$0xf] }
  0x2b   :  { %503 = vmatpush.bf16.msrb.mxu1 %v797_v45  ;;  %516 = vmatpush.bf16.msrb.mxu2 %v801_v46  ;;  %v656_v27 = vld [vmem:[%s1333_s3 + $0x48] sm:$0xf]  ;;  %v693_v28 = vor.u32 %v858_v24, %v692_v23  ;;  %v850_v29 = vld [vmem:[%s1333_s3 + $0x60] sm:$0xf0]  ;;  %v664_v32 = vld [vmem:[%s1333_s3 + $0x50] sm:$0xf] }
  0x2c   :  { %529 = vmatpush.bf16.msrb.mxu3 %v805_v49  ;;  %v658_v31 = vld [vmem:[%s1333_s3 + $0x64] sm:$0xf0]  ;;  %v851_v33 = vld [vmem:[%s1333_s3 + $0x68] sm:$0xf0]  ;;  %v657_v34 = vor.u32 %v850_v29, %v656_v27  ;;  %v628_v36 = vld [vmem:[%s1333_s3 + $0x10] sm:$0xf] }
  0x2d   :  { %v661_v35 = vor.u32 %v847_v30, %v658_v31  ;;  %v665_v37 = vor.u32 %v851_v33, %v664_v32  ;;  %v843_v38 = vld [vmem:[%s1333_s3 + $0x28] sm:$0xf0]  ;;  %v840_v39 = vld [vmem:[%s1333_s3 + $0x14] sm:$0xf]  ;;  %v630_v40 = vld [vmem:[%s1333_s3 + $0x2c] sm:$0xf0] }
  0x2e   :  { %496 = vmatpush.bf16.msrb.mxu0 %v625_v1  ;;  %v636_v41 = vld [vmem:[%s1333_s3 + $0x18] sm:$0xf]  ;;  %v844_v42 = vld [vmem:[%s1333_s3 + $0x30] sm:$0xf0]  ;;  %v895_v43 = vld [vmem:[%s1332_s2] ss:$0 sm:$0xff]  ;;  %v629_v44 = vor.u32 %v843_v38, %v628_v36  ;;  %v633_v45 = vor.u32 %v840_v39, %v630_v40 }
  0x2f   :  { %504 = vmatpush.bf16.msrb.mxu1 %v769_v57  ;;  %517 = vmatpush.bf16.msrb.mxu2 %v773_v58  ;;  %v637_v46 = vor.u32 %v844_v42, %v636_v41  ;;  %v146_v55 = vld [vmem:[%s1334_s4] sm:$0x7f]  ;;  %s938_s4 = smov [#allocation2]   ;;  %s584_s1 = sshll.u32 %s1335_s5, 4  ;;  %vm575_vm1 = vcmask 130048   ;;  %s585_s1 = int_to_ptr.hbm [resolvable:$true] %s584_s1 }
  0x30   :  { %530 = vmatpush.bf16.msrb.mxu3 %v777_v61  ;;  %v148_v56 = vperm.slane %v146_v55, 0  ;;  %v151_v57 = vperm.slane %v146_v55, 3  ;;  %v149_v63 = vperm.slane %v146_v55, 1  ;;  %v150_v1 = vperm.slane %v146_v55, 2  ;;  %s582_s15 = sshll.u32 %s938_s4, 4  ;;  %s583_s15 = int_to_ptr.vmem [resolvable:$true] %s582_s15 }
  0x31   :  { %v152_v14 = vperm.slane %v146_v55, 4 }
  0x33   :  { %505 = vmatpush.bf16.msrb.mxu1 %v741_v5  ;;  %518 = vmatpush.bf16.msrb.mxu2 %v745_v6 }
  0x34   :  { %531 = vmatpush.bf16.msrb.mxu3 %v749_v9 }
  0x37   :  { %506 = vmatpush.bf16.msrb.mxu1 %v713_v13  ;;  %519 = vmatpush.bf16.msrb.mxu2 %v717_v17 }
  0x38   :  { %532 = vmatpush.bf16.msrb.mxu3 %v721_v18 }
  0x3b   :  { %507 = vmatpush.bf16.msrb.mxu1 %v685_v25  ;;  %520 = vmatpush.bf16.msrb.mxu2 %v689_v26  ;;  %v153_v26 = vperm.slane %v146_v55, 5 }
  0x3c   :  { %533 = vmatpush.bf16.msrb.mxu3 %v693_v28  ;;  %v154_v28 = vperm.slane %v146_v55, 6 }
  0x3f   :  { %508 = vmatpush.bf16.msrb.mxu1 %v657_v34  ;;  %521 = vmatpush.bf16.msrb.mxu2 %v661_v35 }
  0x40   :  { %534 = vmatpush.bf16.msrb.mxu3 %v665_v37 }
  0x43   :  { %509 = vmatpush.bf16.msrb.mxu1 %v629_v44  ;;  %522 = vmatpush.bf16.msrb.mxu2 %v633_v45 }
  0x44   :  { %535 = vmatpush.bf16.msrb.mxu3 %v637_v46 }
  0x8e   :  { %v73_v47 = vpop.f32.mrf.mxu0 }
  0x8f   :  { %v74_v48 = vadd.f32 %v895_v43, %v73_v47 }
  0x91   :  { %v77_v49 = vmul.f32 0.5, %v74_v48 }
  0x93   :  { %896 = vtanh.f32 %v77_v49 }
  0x96   :  { %v75_v50 = vpop.f32.mrf.mxu0 }
  0x99   :  { %v897_v51 = vpop.eup %896 }
  0x9a   :  { %v79_v52 = vadd.f32 1.0, %v897_v51 }
  0x9c   :  { %v80_v53 = vmul.f32 0.5, %v79_v52 }
  0x9e   :  { %v81_v54 = vpack.c.bf16 %v80_v53, %v80_v53 }
  0xa0   :  { %458 = vmatmul.bf16.vlgmr.msra.gmra.mxu1 %v81_v54  ;;  %471 = vmatmul.bf16.vlgmr.msra.gmra.mxu2 %v81_v54 }
  0xa1   :  { %484 = vmatmul.bf16.vlgmr.msra.gmra.mxu3 %v81_v54  ;;  %497 = vmatmul.bf16.vlgmr.msrb.gmra.mxu0 %v81_v54 }
  0xb0   :  { %510 = vmatmul.bf16.vlgmr.msrb.gmra.mxu1 %v81_v54  ;;  %523 = vmatmul.bf16.vlgmr.msrb.gmra.mxu2 %v81_v54 }
  0xb1   :  { %536 = vmatmul.bf16.vlgmr.msrb.gmra.mxu3 %v81_v54 }
 0x11d   :  { %v459_v58 = vpop.f32.mrf.mxu1 }
 0x11e   :  { %v460_v59 = vadd.f32 %v459_v58, %v148_v56  ;;  %v498_v60 = vpop.f32.mrf.mxu0 }
 0x11f   :  { %v499_v61 = vadd.f32 %v498_v60, %v151_v57 }
 0x120   :  { %v541_v62 = vmul.f32 0.5, %v460_v59 }
 0x121   :  { %v544_v0 = vmul.f32 0.5, %v499_v61 }
 0x122   :  { %898 = vtanh.f32 %v541_v62 }
 0x123   :  { %900 = vtanh.f32 %v544_v0  ;;  %v472_v2 = vpop.f32.mrf.mxu2 }
 0x124   :  { %v473_v3 = vadd.f32 %v472_v2, %v149_v63  ;;  %v485_v4 = vpop.f32.mrf.mxu3 }
 0x125   :  { %v486_v5 = vadd.f32 %v485_v4, %v150_v1  ;;  %v461_v6 = vpop.f32.mrf.mxu1 }
 0x126   :  { %v542_v7 = vmul.f32 0.5, %v473_v3  ;;  %v500_v8 = vpop.f32.mrf.mxu0 }
 0x127   :  { %v543_v9 = vmul.f32 0.5, %v486_v5 }
 0x128   :  { %v899_v10 = vpop.eup %898  ;;  %902 = vtanh.f32 %v542_v7 }
 0x129   :  { %v901_v11 = vpop.eup %900  ;;  %v555_v12 = vadd.f32 1.0, %v899_v10  ;;  %904 = vtanh.f32 %v543_v9 }
 0x12a   :  { %v558_v13 = vadd.f32 1.0, %v901_v11 }
 0x12b   :  { %v562_v15 = vmul.f32 0.5, %v555_v12  ;;  %v474_v16 = vpop.f32.mrf.mxu2 }
 0x12c   :  { %v565_v17 = vmul.f32 0.5, %v558_v13  ;;  %v487_v18 = vpop.f32.mrf.mxu3 }
 0x12d   :  { %569 = vst [vmem:[#allocation2] sm:$0xff] %v562_v15  ;;  %v511_v19 = vpop.f32.mrf.mxu1 }
 0x12e   :  { %v903_v20 = vpop.eup %902  ;;  %572 = vst [vmem:[#allocation2 + $0x18] sm:$0xff] %v565_v17  ;;  %v512_v21 = vadd.f32 %v511_v19, %v152_v14 }
 0x12f   :  { %v905_v22 = vpop.eup %904  ;;  %v556_v23 = vadd.f32 1.0, %v903_v20 }
 0x130   :  { %v557_v24 = vadd.f32 1.0, %v905_v22  ;;  %v545_v25 = vmul.f32 0.5, %v512_v21 }
 0x131   :  { %v563_v27 = vmul.f32 0.5, %v556_v23 }
 0x132   :  { %v564_v29 = vmul.f32 0.5, %v557_v24  ;;  %906 = vtanh.f32 %v545_v25 }
 0x133   :  { %570 = vst [vmem:[#allocation2 + $0x8] sm:$0xff] %v563_v27  ;;  %v524_v30 = vpop.f32.mrf.mxu2 }
 0x134   :  { %571 = vst [vmem:[#allocation2 + $0x10] sm:$0xff] %v564_v29  ;;  %v525_v31 = vadd.f32 %v524_v30, %v153_v26  ;;  %v537_v32 = vpop.f32.mrf.mxu3 }
 0x135   :  { %v538_v33 = vadd.f32 %v537_v32, %v154_v28  ;;  %v513_v34 = vpop.f32.mrf.mxu1 }
 0x136   :  { %v546_v35 = vmul.f32 0.5, %v525_v31 }
 0x137   :  { %v547_v36 = vmul.f32 0.5, %v538_v33 }
 0x138   :  { %v907_v37 = vpop.eup %906  ;;  %908 = vtanh.f32 %v546_v35 }
 0x139   :  { %v559_v38 = vadd.f32 1.0, %v907_v37  ;;  %910 = vtanh.f32 %v547_v36 }
 0x13b   :  { %v566_v39 = vmul.f32 0.5, %v559_v38  ;;  %v526_v40 = vpop.f32.mrf.mxu2 }
 0x13c   :  { %v539_v41 = vpop.f32.mrf.mxu3 }
 0x13d   :  { %573 = vst [vmem:[#allocation2 + $0x20] sm:$0xff] %v566_v39 }
 0x13e   :  { %v909_v42 = vpop.eup %908 }
 0x13f   :  { %v911_v43 = vpop.eup %910  ;;  %v560_v44 = vadd.f32 1.0, %v909_v42 }
 0x140   :  { %v561_v45 = vadd.f32 1.0, %v911_v43 }
 0x141   :  { %v567_v46 = vmul.f32 0.5, %v560_v44 }
 0x142   :  { %v568_v47 = vmul.f32 0.5, %v561_v45 }
 0x143   :  { %574 = vst [vmem:[#allocation2 + $0x28] sm:$0xff] %v567_v46 }
 0x144   :  { %576 = vst.msk [vmem:[#allocation2 + $0x30] sm:$0xff] %vm575_vm1, %v568_v47 }
 0x145   :  { %587 = dma.vmem_to_hbm [thread:$0]  %s583_s15, 896, %s585_s1, [#allocation3]  }
 0x146   :  { %936 = dma.done.wait [#allocation3], 896  }
 0x147   :  { %937 = vsyncadd [#allocation3], 4294966400 }
 0x148   :  { %592 = vsyncpa [#allocation3], 1 }

</bundles_post_ra>
